<compile_context>
chip_gen: v7x
topology: tpu7x:2x2x1
jax: 0.10.0
libtpu: 0.0.40
codegen_flags: <defaults>
</compile_context>

<pallas_src>
import math
import operator
from functools import reduce

import jax
import jax.numpy as jnp
from jax.experimental import pallas as pl
from jax.experimental.pallas import tpu as pltpu


def _round_up(x, m):
    return (x + m - 1) // m * m


# ----------------------------------------------------------------------------
# Kernels.
# ----------------------------------------------------------------------------
# Single K-tile fast path: no scratch accumulator, no pl.when, direct store.
def _kernel_single_bias(x_ref, wt_ref, b_ref, o_ref):
    acc = jnp.dot(x_ref[...], wt_ref[...], preferred_element_type=jnp.float32)
    o_ref[...] = (acc + b_ref[...].astype(jnp.float32)).astype(o_ref.dtype)


def _kernel_single_nobias(x_ref, wt_ref, o_ref):
    acc = jnp.dot(x_ref[...], wt_ref[...], preferred_element_type=jnp.float32)
    o_ref[...] = acc.astype(o_ref.dtype)


# K-tiled reduction path: f32 accumulator scratch, init on k==0, bias-add and
# writeback on the last K step only (output block resident across k).
def _kernel_ktiled_bias(x_ref, wt_ref, b_ref, o_ref, acc_ref):
    k = pl.program_id(2)

    @pl.when(k == 0)
    def _():
        acc_ref[...] = jnp.zeros_like(acc_ref)

    acc_ref[...] += jnp.dot(
        x_ref[...], wt_ref[...], preferred_element_type=jnp.float32
    )

    @pl.when(k == pl.num_programs(2) - 1)
    def _():
        o_ref[...] = (
            acc_ref[...] + b_ref[...].astype(jnp.float32)
        ).astype(o_ref.dtype)


def _kernel_ktiled_nobias(x_ref, wt_ref, o_ref, acc_ref):
    k = pl.program_id(2)

    @pl.when(k == 0)
    def _():
        acc_ref[...] = jnp.zeros_like(acc_ref)

    acc_ref[...] += jnp.dot(
        x_ref[...], wt_ref[...], preferred_element_type=jnp.float32
    )

    @pl.when(k == pl.num_programs(2) - 1)
    def _():
        o_ref[...] = acc_ref[...].astype(o_ref.dtype)


# ----------------------------------------------------------------------------
# Wrapper: pads to tile-aligned, lane-dense shapes, launches the tiled grid,
# slices the valid region back out.
# ----------------------------------------------------------------------------
def mixlinear_matmul(x2d, w_t, bias=None, *, tm=256, tn=256, tk=512,
                     out_dtype=jnp.float32):
    M, K = x2d.shape
    K2, N = w_t.shape
    assert K == K2, (K, K2)

    # Shrink tiles for small problems but keep (8, 128) alignment; for large
    # problems the defaults (256/256/512) fill the 256x256 MXU on v6e/v7x and
    # keep the double-buffered VMEM footprint a few MiB (safe on v7x's 64 MiB).
    tm = min(tm, _round_up(M, 8))
    tn = min(tn, _round_up(N, 128))   # lane-dense output tile
    tk = min(tk, _round_up(K, 128))

    M_p, N_p, K_p = _round_up(M, tm), _round_up(N, tn), _round_up(K, tk)

    x_p = x2d
    if (M_p, K_p) != (M, K):
        x_p = jnp.pad(x2d, ((0, M_p - M), (0, K_p - K)))
    w_p = w_t
    if (K_p, N_p) != (K, N):
        w_p = jnp.pad(w_t, ((0, K_p - K), (0, N_p - N)))

    kt = K_p // tk
    single_k = kt == 1
    out_itemsize = jnp.dtype(out_dtype).itemsize

    bias_bytes = 0
    if bias is not None:
        b_row = bias.reshape(1, N).astype(jnp.float32)
        if N_p != N:
            b_row = jnp.pad(b_row, ((0, 0), (0, N_p - N)))
        bias_bytes = b_row.size * b_row.dtype.itemsize

    cost = pl.CostEstimate(
        flops=2 * M_p * N_p * K_p,
        transcendentals=0,
        bytes_accessed=(
            x_p.size * x_p.dtype.itemsize
            + w_p.size * w_p.dtype.itemsize
            + bias_bytes
            + M_p * N_p * out_itemsize
        ),
    )

    # Explicit VMEM budget: double-buffered x/w/out tiles + f32 accumulator,
    # with headroom; clamped so it is valid on every generation (v7x: 64 MiB).
    tile_bytes = (
        2 * (tm * tk * x_p.dtype.itemsize + tk * tn * w_p.dtype.itemsize)
        + 2 * tm * tn * out_itemsize
        + (0 if single_k else tm * tn * 4)
        + 2 * tn * 4
    )
    vmem_limit = min(max(2 * tile_bytes + (1 << 20), 4 << 20), 32 << 20)

    if single_k:
        grid = (M_p // tm, N_p // tn)
        x_spec = pl.BlockSpec((tm, tk), lambda i, j: (i, 0))
        w_spec = pl.BlockSpec((tk, tn), lambda i, j: (0, j))
        o_spec = pl.BlockSpec((tm, tn), lambda i, j: (i, j))
        b_spec = pl.BlockSpec((1, tn), lambda i, j: (0, j))
        scratch = []
        semantics = ("parallel", "parallel")
        kernel = _kernel_single_bias if bias is not None else _kernel_single_nobias
    else:
        grid = (M_p // tm, N_p // tn, kt)
        x_spec = pl.BlockSpec((tm, tk), lambda i, j, k: (i, k))
        w_spec = pl.BlockSpec((tk, tn), lambda i, j, k: (k, j))
        o_spec = pl.BlockSpec((tm, tn), lambda i, j, k: (i, j))
        b_spec = pl.BlockSpec((1, tn), lambda i, j, k: (0, j))
        scratch = [pltpu.VMEM((tm, tn), jnp.float32)]
        semantics = ("parallel", "parallel", "arbitrary")
        kernel = _kernel_ktiled_bias if bias is not None else _kernel_ktiled_nobias

    if bias is not None:
        in_specs = [x_spec, w_spec, b_spec]
        operands = (x_p, w_p, b_row)
    else:
        in_specs = [x_spec, w_spec]
        operands = (x_p, w_p)

    out = pl.pallas_call(
        kernel,
        out_shape=jax.ShapeDtypeStruct((M_p, N_p), out_dtype),
        grid_spec=pltpu.PrefetchScalarGridSpec(
            num_scalar_prefetch=0,
            grid=grid,
            in_specs=in_specs,
            out_specs=o_spec,
            scratch_shapes=scratch,
        ),
        compiler_params=pltpu.CompilerParams(
            dimension_semantics=semantics,
            vmem_limit_bytes=vmem_limit,
        ),
        cost_estimate=cost,
    )(*operands)

    if (M_p, N_p) != (M, N):
        out = out[:M, :N]
    return out


# ----------------------------------------------------------------------------
# mixout on the weight (plain-JAX glue; identity when p==0 or eval, exactly
# like the PyTorch Mixout.forward default configuration).
# ----------------------------------------------------------------------------
def mixout_weight(weight, target=None, p=0.0, training=False, key=None):
    if p < 0 or p > 1:
        raise ValueError("A mix probability of mixout has to be between 0 and 1")
    if p == 0.0 or not training:
        return weight
    if target is None:
        target = jnp.zeros_like(weight)
    if p == 1.0:
        return target
    if key is None:
        key = jax.random.PRNGKey(0)
    # PyTorch draws one Bernoulli row (shape (in_features,)) and repeats it
    # across the out_features rows for ndim > 1 weights.
    noise_row = jax.random.bernoulli(key, 1.0 - p, (1, weight.shape[1])).astype(
        weight.dtype
    )
    noise = jnp.broadcast_to(noise_row, weight.shape)
    return ((1.0 - noise) * target + noise * weight - p * target) / (1.0 - p)


# ----------------------------------------------------------------------------
# MixLinear module in JAX.
# ----------------------------------------------------------------------------
class MixLinear:
    def __init__(self, in_features, out_features, bias=True, target=None,
                 p=0.0, key=jax.random.PRNGKey(0), compute_dtype=jnp.bfloat16):
        self.in_features = in_features
        self.out_features = out_features
        self.target = target
        self.p = p
        self.training = False  # eval mode (forward-pass reproduction)
        self.compute_dtype = compute_dtype

        wkey, bkey = jax.random.split(key)
        # kaiming_uniform_(a=sqrt(5)) on (out, in): bound = 1/sqrt(fan_in)
        fan_in = in_features
        w_bound = 1.0 / math.sqrt(fan_in)
        self.weight = jax.random.uniform(
            wkey, (out_features, in_features), jnp.float32, -w_bound, w_bound
        )
        if bias:
            b_bound = 1.0 / math.sqrt(fan_in)
            self.bias = jax.random.uniform(
                bkey, (out_features,), jnp.float32, -b_bound, b_bound
            )
        else:
            self.bias = None

        # Cache W^T in the compute dtype once (hot / eval path): avoids a
        # full weight-sized transpose + cast on every forward call.
        self.weight_t = jnp.transpose(self.weight).astype(compute_dtype)

    def __call__(self, x, key=None):
        if self.p == 0.0 or not self.training:
            w_t = self.weight_t  # cached, identity mixout
        else:
            w = mixout_weight(self.weight, self.target, self.p, True, key)
            w_t = jnp.transpose(w).astype(self.compute_dtype)

        lead = x.shape[:-1]
        rows = reduce(operator.mul, lead, 1) if lead else 1
        x2d = x.reshape(rows, self.in_features).astype(self.compute_dtype)
        y2d = mixlinear_matmul(x2d, w_t, self.bias, out_dtype=jnp.float32)
        return y2d.reshape(*lead, self.out_features)


if __name__ == "__main__":
    key = jax.random.PRNGKey(0)
    k_x, k_p = jax.random.split(key)

    batch, seq, in_features, out_features = 2, 8, 32, 16
    x = jax.random.normal(k_x, (batch, seq, in_features), jnp.float32)

    layer = MixLinear(in_features, out_features, bias=True, p=0.0, key=k_p)
    y = layer(x)
    y = jax.block_until_ready(y)
    assert y.shape == (batch, seq, out_features)
    assert y.dtype == jnp.float32

    # Reference in plain JAX with the same bf16 operand rounding.
    x_bf = x.astype(jnp.bfloat16).astype(jnp.float32)
    w_bf = layer.weight.astype(jnp.bfloat16).astype(jnp.float32)
    y_ref = x_bf @ w_bf.T + layer.bias
    assert jnp.allclose(y, y_ref, atol=2e-2, rtol=2e-2)

    print("KERNEL_OK")
</pallas_src>

<mosaic_0001>
module attributes {stable_mosaic.version = 11 : i64} {
  func.func @_kernel_single_bias(%arg0: i32, %arg1: i32, %arg2: memref<16x128xbf16, #tpu.memory_space<vmem>>, %arg3: memref<128x128xbf16, #tpu.memory_space<vmem>>, %arg4: memref<1x128xf32, #tpu.memory_space<vmem>>, %arg5: memref<16x128xf32, #tpu.memory_space<vmem>>) attributes {dimension_semantics = [#tpu.dimension_semantics<parallel>, #tpu.dimension_semantics<parallel>], iteration_bounds = array<i64: 1, 1>, scalar_prefetch = 0 : i64, scratch_operands = 0 : i64, tpu.core_type = #tpu.core_type<tc>, window_params = [{transform_indices = @transform_0, window_bounds = array<i64: 16, 128>}, {transform_indices = @transform_1, window_bounds = array<i64: 128, 128>}, {transform_indices = @transform_2, window_bounds = array<i64: 1, 128>}, {transform_indices = @transform_3, window_bounds = array<i64: 16, 128>}]} {
    %c0 = arith.constant 0 : index
    %c0_0 = arith.constant 0 : index
    %0 = vector.load %arg2[%c0, %c0_0] : memref<16x128xbf16, #tpu.memory_space<vmem>>, vector<16x128xbf16>
    %c0_1 = arith.constant 0 : index
    %c0_2 = arith.constant 0 : index
    %1 = vector.load %arg3[%c0_1, %c0_2] : memref<128x128xbf16, #tpu.memory_space<vmem>>, vector<128x128xbf16>
    %cst = arith.constant dense<0.000000e+00> : vector<16x128xf32>
    %2 = tpu.matmul %0, %1, %cst {dimension_numbers = #tpu.dot_dimension_numbers<[1], [0], [0], [1], [0, 0, 1, 1], [], []>} : vector<16x128xbf16>, vector<128x128xbf16>, vector<16x128xf32> -> vector<16x128xf32>
    %c0_3 = arith.constant 0 : index
    %c0_4 = arith.constant 0 : index
    %3 = vector.load %arg4[%c0_3, %c0_4] : memref<1x128xf32, #tpu.memory_space<vmem>>, vector<1x128xf32>
    %4 = vector.broadcast %3 : vector<1x128xf32> to vector<16x128xf32>
    %5 = arith.addf %2, %4 : vector<16x128xf32>
    %c0_5 = arith.constant 0 : index
    %c0_6 = arith.constant 0 : index
    %6 = vector.load %arg5[%c0_5, %c0_6] : memref<16x128xf32, #tpu.memory_space<vmem>>, vector<16x128xf32>
    tpu.vector_store %arg5[%c0_5, %c0_6], %5 {strides = array<i32>} : memref<16x128xf32, #tpu.memory_space<vmem>>, vector<16x128xf32>,
    return
  }
  func.func @transform_0(%arg0: i32, %arg1: i32) -> (i32, i32) {
    %c0_i32 = arith.constant 0 : i32
    %c0_i32_0 = arith.constant 0 : i32
    return %arg0, %c0_i32 : i32, i32
  }
  func.func @transform_1(%arg0: i32, %arg1: i32) -> (i32, i32) {
    %c0_i32 = arith.constant 0 : i32
    %c0_i32_0 = arith.constant 0 : i32
    return %c0_i32, %arg1 : i32, i32
  }
  func.func @transform_2(%arg0: i32, %arg1: i32) -> (i32, i32) {
    %c0_i32 = arith.constant 0 : i32
    %c0_i32_0 = arith.constant 0 : i32
    return %c0_i32, %arg1 : i32, i32
  }
  func.func @transform_3(%arg0: i32, %arg1: i32) -> (i32, i32) {
    %c0_i32 = arith.constant 0 : i32
    return %arg0, %arg1 : i32, i32
  }
}

</mosaic_0001>

<bundles_post_ra>
// kernel: tpu_custom_call.1
= control target key start
LH: loop header
LB: loop body
LE: loop exit
PB: predicated region body
PF: predicated region fallthrough
CT: control target
= control target key end

     0   :  { %8 = vsyncpa [#allocation3], 0  ;;  %s381_s0 = inlined_call_operand.hbm [shape: bf16[16,128], index: 0, kind: input, shape index: {}]   ;;  %s382_s1 = inlined_call_operand.hbm [shape: bf16[128,128], index: 1, kind: input, shape index: {}]   ;;  %s383_s2 = inlined_call_operand.vmem [shape: f32[1,128], index: 2, kind: input, shape index: {}]   ;;  %s384_s3 = inlined_call_operand.hbm [shape: f32[16,128], index: 3, kind: output, shape index: {}]  }
   0x1   :  { %9 = vsyncpa [#allocation6], 0 }
   0x2   :  { %10 = vsyncpa [#allocation4], 0  ;;  %s313_s12 = smov [#allocation2]   ;;  %s241_s16 = scalar_lea.hbm %s381_s0, 128 }
   0x3   :  { %s16_s13 = sshll.u32 %s313_s12, 4  ;;  %p242_p0 = scmp.ne.s32.totalorder %s381_s0, %s241_s16  ;;  %s17_s13 = int_to_ptr.vmem [resolvable:$true] %s16_s13 }
   0x4   :  { %p245_p1 = scmp.lt.u32.totalorder %s241_s16, %s381_s0 }
   0x6   :  { %p247_p2 = pnand %p245_p1, %p242_p0 }
   0x8   :  { %250 = shalt.err (!%p247_p2)
}
   0x9   :  { %s251_s21 = scalar_lea.vmem %s17_s13, 128  ;;  %p256_p4 = scmp.lt.s32.totalorder %s17_s13, %s17_s13 }
   0xa   :  { %p252_p3 = scmp.ne.s32.totalorder %s17_s13, %s251_s21  ;;  %p257_p5 = scmp.lt.s32.totalorder %s251_s21, %s251_s21 }
   0xc   :  { %p258_p6 = por %p257_p5, %p256_p4 }
   0xe   :  { %p259_p7 = pnand %p258_p6, %p252_p3 }
  0x10   :  { %262 = shalt.err (!%p259_p7)
}
  0x11   :  { %s314_s22 = smov 64   ;;  %s315_s23 = smov 4  }
  0x12   :  { %22 = dma.hbm_to_vmem [thread:$0]  %s381_s0, 128, %s17_s13, [#allocation3], %s314_s22, %s314_s22, %s315_s23  }
  0x13   :  { %s316_s26 = smov [#allocation5]   ;;  %s263_s30 = scalar_lea.hbm %s382_s1, 1024 }
  0x14   :  { %s28_s27 = sshll.u32 %s316_s26, 4  ;;  %p264_p8 = scmp.ne.s32.totalorder %s382_s1, %s263_s30  ;;  %s29_s27 = int_to_ptr.vmem [resolvable:$true] %s28_s27 }
  0x15   :  { %p267_p9 = scmp.lt.u32.totalorder %s263_s30, %s382_s1 }
  0x17   :  { %p269_p10 = pnand %p267_p9, %p264_p8 }
  0x19   :  { %272 = shalt.err (!%p269_p10)
}
  0x1a   :  { %s273_s8 = scalar_lea.vmem %s29_s27, 1024  ;;  %p278_p12 = scmp.lt.s32.totalorder %s29_s27, %s29_s27 }
  0x1b   :  { %p274_p11 = scmp.ne.s32.totalorder %s29_s27, %s273_s8  ;;  %p279_p13 = scmp.lt.s32.totalorder %s273_s8, %s273_s8 }
  0x1d   :  { %p280_p0 = por %p279_p13, %p278_p12 }
  0x1f   :  { %p281_p1 = pnand %p280_p0, %p274_p11 }
  0x21   :  { %284 = shalt.err (!%p281_p1)
}
  0x22   :  { %34 = dma.hbm_to_vmem [thread:$0]  %s382_s1, 1024, %s29_s27, [#allocation6], %s314_s22, %s314_s22, %s315_s23  }
  0x23   :  { %307 = dma.done.wait [#allocation3], 128  }
  0x24   :  { %308 = vsyncadd [#allocation3], 4294967168 }
  0x25   :  { %309 = dma.done.wait [#allocation6], 1024  }
  0x26   :  { %310 = vsyncadd [#allocation6], 4294966272  ;;  %v317_v0 = vmov 0.0   ;;  %vm318_vm0 = vmmov 0   ;;  %v232_v1 = vld [vmem:[#allocation5] sm:$0xff]   ;;  %v233_v2 = vld [vmem:[#allocation5 + $0x8] sm:$0xff]  }
  0x27   :  { %203 = vmatprep.subr.bf16.mxu0 %v317_v0  ;;  %219 = vmatprep.mubr.msk.bf16.mxu0 %vm318_vm0, %v317_v0  ;;  %v234_v3 = vld [vmem:[#allocation5 + $0x10] sm:$0xff]   ;;  %v235_v4 = vld [vmem:[#allocation5 + $0x18] sm:$0xff]   ;;  %v236_v5 = vld [vmem:[#allocation5 + $0x20] sm:$0xff]   ;;  %s319_s11 = smov [#allocation7]  }
  0x28   :  { %204 = vmatpush3.bf16.msra.mxu0 %v232_v1  ;;  %v237_v6 = vld [vmem:[#allocation5 + $0x28] sm:$0xff]   ;;  %v238_v7 = vld [vmem:[#allocation5 + $0x30] sm:$0xff]   ;;  %v239_v8 = vld [vmem:[#allocation5 + $0x38] sm:$0xff]   ;;  %s171_s12 = sshll.u32 %s319_s11, 4  ;;  %s172_s12 = int_to_ptr.vmem [resolvable:$true] %s171_s12 }
  0x29   :  { %205 = vmatprep.subr.bf16.mxu0 %v317_v0  ;;  %v240_v9 = vld [vmem:[#allocation2] sm:$0xff]   ;;  %s285_s13 = scalar_lea.vmem %s172_s12, 256  ;;  %p290_p3 = scmp.lt.s32.totalorder %s172_s12, %s172_s12 }
  0x2a   :  { %v184_v10 = vld [vmem:[%s383_s2] ss:$0 sm:$0xff]  ;;  %p286_p2 = scmp.ne.s32.totalorder %s172_s12, %s285_s13  ;;  %p291_p4 = scmp.lt.s32.totalorder %s285_s13, %s285_s13 }
  0x2c   :  { %206 = vmatpush3.bf16.msra.mxu0 %v233_v2  ;;  %p292_p5 = por %p291_p4, %p290_p3 }
  0x2d   :  { %207 = vmatprep.subr.bf16.mxu0 %v317_v0 }
  0x2e   :  { %p293_p6 = pnand %p292_p5, %p286_p2 }
  0x30   :  { %208 = vmatpush3.bf16.msra.mxu0 %v234_v3 }
  0x31   :  { %209 = vmatprep.subr.bf16.mxu0 %v317_v0 }
  0x34   :  { %210 = vmatpush3.bf16.msra.mxu0 %v235_v4 }
  0x35   :  { %211 = vmatprep.subr.bf16.mxu0 %v317_v0 }
  0x38   :  { %212 = vmatpush3.bf16.msra.mxu0 %v236_v5 }
  0x39   :  { %213 = vmatprep.subr.bf16.mxu0 %v317_v0 }
  0x3c   :  { %214 = vmatpush3.bf16.msra.mxu0 %v237_v6 }
  0x3d   :  { %215 = vmatprep.subr.bf16.mxu0 %v317_v0 }
  0x40   :  { %216 = vmatpush3.bf16.msra.mxu0 %v238_v7 }
  0x41   :  { %217 = vmatprep.subr.bf16.mxu0 %v317_v0 }
  0x44   :  { %218 = vmatpush3.bf16.msra.mxu0 %v239_v8 }
  0x47   :  { %220 = vmatmul.mubr.bf16.vlgmr.msra.gmra.mrb[0].mxu0 %v240_v9 }
 0x11a   :  { %v157_v11 = vpop.f32.mrb[0].mxu0 }
 0x11b   :  { %v158_v12 = vadd.f32 %v184_v10, %v157_v11  ;;  %v221_v13 = vpop.f32.mrb[1].mxu0 }
 0x11c   :  { %v160_v14 = vpop.f32.mrb[2].mxu0 }
 0x11d   :  { %164 = vst [vmem:[#allocation7] sm:$0xff] %v158_v12  ;;  %v161_v15 = vadd.f32 %v184_v10, %v160_v14  ;;  %v222_v16 = vpop.f32.mrb[3].mxu0 }
 0x11f   :  { %165 = vst [vmem:[#allocation7 + $0x8] sm:$0xff] %v161_v15 }
 0x120   :  { %296 = shalt.err (!%p293_p6)
}
 0x121   :  { %s297_s15 = scalar_lea.hbm %s384_s3, 256 }
 0x122   :  { %p298_p7 = scmp.ne.s32.totalorder %s384_s3, %s297_s15  ;;  %p301_p8 = scmp.lt.u32.totalorder %s297_s15, %s384_s3 }
 0x124   :  { %p303_p9 = pnand %p301_p8, %p298_p7 }
 0x126   :  { %306 = shalt.err (!%p303_p9)
}
 0x127   :  { %s320_s20 = smov 128   ;;  %s321_s21 = smov 8  }
 0x128   :  { %177 = dma.vmem_to_hbm [thread:$0]  %s172_s12, 256, %s384_s3, [#allocation4], %s320_s20, %s320_s20, %s321_s21  }
 0x129   :  { %311 = dma.done.wait [#allocation4], 256  }
 0x12a   :  { %312 = vsyncadd [#allocation4], 4294967040 }
 0x12b   :  { %181 = vsyncpa [#allocation3], 1 }
 0x12c   :  { %182 = vsyncpa [#allocation6], 1 }
 0x12d   :  { %183 = vsyncpa [#allocation4], 1 }

</bundles_post_ra>
